<compile_context>
chip_gen: v6e
topology: v6e:2x2x1
jax: 0.10.0
libtpu: 0.0.40
codegen_flags: <defaults>
</compile_context>

<pallas_src>
import functools

import jax
import jax.numpy as jnp
from jax.experimental import pallas as pl
from jax.experimental.pallas import tpu as pltpu

HIDDEN = 256
LANE = 128
SUBLANE_BF16 = 16       # bf16 packs 16 sublanes per vreg
MAX_TILE_M = 1024       # large-batch tile cap (sweepable 1024-2048)


def _round_up(n, m):
    return (n + m - 1) // m * m


def _mlp_kernel(x_ref, w12_ref, w3_ref, b_ref, o_ref, *, in_pad, out_pad):
    """o = relu(relu(x@W1+b1)@W2+b2)@W3+b3 for one batch tile.

    x_ref:   (tile_m, in_pad)          f32   cast to bf16 in-kernel
    w12_ref: (in_pad + HIDDEN, HIDDEN) bf16  W1 rows then W2 rows
    w3_ref:  (HIDDEN, out_pad)         bf16
    b_ref:   (3, max(HIDDEN, out_pad)) f32   b1 / b2 / b3 rows
    o_ref:   (tile_m, out_pad)         f32
    """
    # f32 HBM read, cheap VPU cast to bf16 for the MXU (no wrapper-side pass).
    x = x_ref[...].astype(jnp.bfloat16)

    # Static, tile-aligned slices of the packed W1/W2 buffer -> zero-cost views
    # (in_pad is a multiple of 16 == bf16 sublane tile).
    w1 = w12_ref[0:in_pad, :]
    w2 = w12_ref[in_pad:in_pad + HIDDEN, :]

    # bf16 operands on the MXU, f32 accumulation; bias add + ReLU in f32 on the
    # VPU (v5e has no bf16 VPU), then cast back to bf16 for the next matmul.
    h1 = jnp.dot(x, w1, preferred_element_type=jnp.float32)
    h1 = jnp.maximum(h1 + b_ref[0:1, 0:HIDDEN], 0.0).astype(jnp.bfloat16)

    h2 = jnp.dot(h1, w2, preferred_element_type=jnp.float32)
    h2 = jnp.maximum(h2 + b_ref[1:2, 0:HIDDEN], 0.0).astype(jnp.bfloat16)

    out = jnp.dot(h2, w3_ref[...], preferred_element_type=jnp.float32)
    out = out + b_ref[2:3, 0:out_pad]
    o_ref[...] = out.astype(o_ref.dtype)


@functools.partial(jax.jit, static_argnames=("output_dims",))
def mlp_forward(x, w12_packed, w3, biases, *, output_dims):
    batch, input_dims = x.shape
    in_pad = _round_up(input_dims, SUBLANE_BF16)
    out_pad = w3.shape[1]
    assert w12_packed.shape == (in_pad + HIDDEN, HIDDEN)
    assert out_pad == _round_up(output_dims, LANE)

    # Batch tiling:
    #  * tiny batches -> single 16-row-aligned tile (native bf16 packing)
    #  * large batches -> up to MAX_TILE_M-row tiles to amortize the ~0.35us
    #    per-grid-step overhead, but always >= 2 grid steps so the "parallel"
    #    axis shards across both TensorCores on v7x.
    if batch <= 2 * SUBLANE_BF16:
        tile_m = _round_up(batch, SUBLANE_BF16)
    else:
        tile_m = min(MAX_TILE_M,
                     _round_up(pl.cdiv(batch, 2), SUBLANE_BF16))
    batch_pad = _round_up(batch, tile_m)

    pad_m = batch_pad - batch
    pad_k = in_pad - input_dims
    x_p = x if (pad_m == 0 and pad_k == 0) else jnp.pad(x, ((0, pad_m), (0, pad_k)))

    flops = 2 * batch_pad * (in_pad * HIDDEN + HIDDEN * HIDDEN + HIDDEN * out_pad)
    bytes_accessed = (x_p.size * 4 + w12_packed.size * 2 + w3.size * 2
                      + biases.size * 4 + batch_pad * out_pad * 4)

    kernel = functools.partial(_mlp_kernel, in_pad=in_pad, out_pad=out_pad)

    out = pl.pallas_call(
        kernel,
        out_shape=jax.ShapeDtypeStruct((batch_pad, out_pad), jnp.float32),
        grid=(batch_pad // tile_m,),
        in_specs=[
            pl.BlockSpec((tile_m, in_pad), lambda i: (i, 0)),
            pl.BlockSpec(w12_packed.shape, lambda i: (0, 0)),  # VMEM-resident
            pl.BlockSpec(w3.shape, lambda i: (0, 0)),          # VMEM-resident
            pl.BlockSpec(biases.shape, lambda i: (0, 0)),      # VMEM-resident
        ],
        out_specs=pl.BlockSpec((tile_m, out_pad), lambda i: (i, 0)),
        compiler_params=pltpu.CompilerParams(
            dimension_semantics=("parallel",)),
        cost_estimate=pl.CostEstimate(
            flops=flops, transcendentals=0, bytes_accessed=bytes_accessed),
    )(x_p, w12_packed, w3, biases)

    return out[:batch, :output_dims]


def init_params(key, input_dims, output_dims):
    """PyTorch nn.Linear-style init (U(-k, k), k = 1/sqrt(fan_in)), packed.

    Returns:
      w12_packed: bf16 (in_pad + HIDDEN, HIDDEN)   W1 rows then W2 rows, (in, out)
      w3:         bf16 (HIDDEN, out_pad)           zero-padded output lanes
      biases:     f32  (3, max(HIDDEN, out_pad))   b1 / b2 / b3 rows, zero-padded
    """
    in_pad = _round_up(input_dims, SUBLANE_BF16)
    out_pad = _round_up(output_dims, LANE)
    bias_w = max(HIDDEN, out_pad)
    keys = jax.random.split(key, 6)

    def linear(kw, kb, fan_in, fan_out):
        bound = float(fan_in) ** -0.5
        w = jax.random.uniform(kw, (fan_in, fan_out), jnp.float32, -bound, bound)
        b = jax.random.uniform(kb, (fan_out,), jnp.float32, -bound, bound)
        return w, b

    w1, b1 = linear(keys[0], keys[1], input_dims, HIDDEN)
    w2, b2 = linear(keys[2], keys[3], HIDDEN, HIDDEN)
    w3, b3 = linear(keys[4], keys[5], HIDDEN, output_dims)

    w12 = jnp.zeros((in_pad + HIDDEN, HIDDEN), jnp.float32)
    w12 = w12.at[:input_dims, :].set(w1)
    w12 = w12.at[in_pad:, :].set(w2)
    w12 = w12.astype(jnp.bfloat16)

    w3p = jnp.zeros((HIDDEN, out_pad), jnp.float32)
    w3p = w3p.at[:, :output_dims].set(w3).astype(jnp.bfloat16)

    biases = jnp.zeros((3, bias_w), jnp.float32)
    biases = biases.at[0, :HIDDEN].set(b1)
    biases = biases.at[1, :HIDDEN].set(b2)
    biases = biases.at[2, :output_dims].set(b3)

    return w12, w3p, biases


def reference_forward(x, w12_packed, w3, biases, input_dims, output_dims):
    """Pure-JAX reference using the same bf16-rounded weights/activations."""
    in_pad = _round_up(input_dims, SUBLANE_BF16)
    wf = w12_packed.astype(jnp.float32)
    w1 = wf[:input_dims, :]
    w2 = wf[in_pad:, :]
    w3f = w3.astype(jnp.float32)[:, :output_dims]
    b1 = biases[0, :HIDDEN]
    b2 = biases[1, :HIDDEN]
    b3 = biases[2, :output_dims]

    xb = x.astype(jnp.bfloat16).astype(jnp.float32)
    h1 = jnp.maximum(xb @ w1 + b1, 0.0)
    h1 = h1.astype(jnp.bfloat16).astype(jnp.float32)
    h2 = jnp.maximum(h1 @ w2 + b2, 0.0)
    h2 = h2.astype(jnp.bfloat16).astype(jnp.float32)
    return h2 @ w3f + b3


if __name__ == "__main__":
    key = jax.random.PRNGKey(0)
    k_x, k_p = jax.random.split(key)

    batch = 8
    input_dims = 32     # e.g. RL observation size
    output_dims = 8     # e.g. RL action size

    x = jax.random.normal(k_x, (batch, input_dims), dtype=jnp.float32)
    w12_packed, w3, biases = init_params(k_p, input_dims, output_dims)

    out = mlp_forward(x, w12_packed, w3, biases, output_dims=output_dims)
    out = jax.block_until_ready(out)

    ref = reference_forward(x, w12_packed, w3, biases, input_dims, output_dims)
    assert out.shape == (batch, output_dims)
    assert jnp.allclose(out, ref, atol=1e-2, rtol=1e-2), "mismatch vs reference"

    print("KERNEL_OK")
</pallas_src>

<mosaic_0001>
module attributes {stable_mosaic.version = 11 : i64} {
  func.func @_mlp_kernel(%arg0: i32, %arg1: memref<16x32xf32, #tpu.memory_space<vmem>>, %arg2: memref<288x256xbf16, #tpu.memory_space<vmem>>, %arg3: memref<256x128xbf16, #tpu.memory_space<vmem>>, %arg4: memref<3x256xf32, #tpu.memory_space<vmem>>, %arg5: memref<16x128xf32, #tpu.memory_space<vmem>>) attributes {dimension_semantics = [#tpu.dimension_semantics<parallel>], iteration_bounds = array<i64: 1>, scalar_prefetch = 0 : i64, scratch_operands = 0 : i64, tpu.core_type = #tpu.core_type<tc>, window_params = [{transform_indices = @transform_0, window_bounds = array<i64: 16, 32>}, {pipeline_mode = #tpu.pipeline_mode<synchronous>, transform_indices = @transform_1, window_bounds = array<i64: 288, 256>}, {pipeline_mode = #tpu.pipeline_mode<synchronous>, transform_indices = @transform_2, window_bounds = array<i64: 256, 128>}, {pipeline_mode = #tpu.pipeline_mode<synchronous>, transform_indices = @transform_3, window_bounds = array<i64: 3, 256>}, {transform_indices = @transform_4, window_bounds = array<i64: 16, 128>}]} {
    %c0 = arith.constant 0 : index
    %c0_0 = arith.constant 0 : index
    %0 = vector.load %arg1[%c0, %c0_0] : memref<16x32xf32, #tpu.memory_space<vmem>>, vector<16x32xf32>
    %1 = arith.truncf %0 : vector<16x32xf32> to vector<16x32xbf16>
    %c0_1 = arith.constant 0 : index
    %c0_2 = arith.constant 0 : index
    %2 = vector.load %arg2[%c0_1, %c0_2] : memref<288x256xbf16, #tpu.memory_space<vmem>>, vector<32x256xbf16>
    %c32 = arith.constant 32 : index
    %c0_3 = arith.constant 0 : index
    %3 = vector.load %arg2[%c32, %c0_3] : memref<288x256xbf16, #tpu.memory_space<vmem>>, vector<256x256xbf16>
    %cst = arith.constant dense<0.000000e+00> : vector<16x256xf32>
    %4 = tpu.matmul %1, %2, %cst {dimension_numbers = #tpu.dot_dimension_numbers<[1], [0], [0], [1], [0, 0, 1, 1], [], []>} : vector<16x32xbf16>, vector<32x256xbf16>, vector<16x256xf32> -> vector<16x256xf32>
    %c0_4 = arith.constant 0 : index
    %c0_5 = arith.constant 0 : index
    %5 = vector.load %arg4[%c0_4, %c0_5] : memref<3x256xf32, #tpu.memory_space<vmem>>, vector<1x256xf32>
    %6 = vector.broadcast %5 : vector<1x256xf32> to vector<16x256xf32>
    %7 = arith.addf %4, %6 : vector<16x256xf32>
    %cst_6 = arith.constant 0.000000e+00 : f32
    %8 = vector.broadcast %cst_6 : f32 to vector<16x256xf32>
    %9 = arith.maximumf %7, %8 : vector<16x256xf32>
    %10 = arith.truncf %9 : vector<16x256xf32> to vector<16x256xbf16>
    %cst_7 = arith.constant dense<0.000000e+00> : vector<16x256xf32>
    %11 = tpu.matmul %10, %3, %cst_7 {dimension_numbers = #tpu.dot_dimension_numbers<[1], [0], [0], [1], [0, 0, 1, 1], [], []>} : vector<16x256xbf16>, vector<256x256xbf16>, vector<16x256xf32> -> vector<16x256xf32>
    %c1 = arith.constant 1 : index
    %c0_8 = arith.constant 0 : index
    %12 = vector.load %arg4[%c1, %c0_8] : memref<3x256xf32, #tpu.memory_space<vmem>>, vector<1x256xf32>
    %13 = vector.broadcast %12 : vector<1x256xf32> to vector<16x256xf32>
    %14 = arith.addf %11, %13 : vector<16x256xf32>
    %cst_9 = arith.constant 0.000000e+00 : f32
    %15 = vector.broadcast %cst_9 : f32 to vector<16x256xf32>
    %16 = arith.maximumf %14, %15 : vector<16x256xf32>
    %17 = arith.truncf %16 : vector<16x256xf32> to vector<16x256xbf16>
    %c0_10 = arith.constant 0 : index
    %c0_11 = arith.constant 0 : index
    %18 = vector.load %arg3[%c0_10, %c0_11] : memref<256x128xbf16, #tpu.memory_space<vmem>>, vector<256x128xbf16>
    %cst_12 = arith.constant dense<0.000000e+00> : vector<16x128xf32>
    %19 = tpu.matmul %17, %18, %cst_12 {dimension_numbers = #tpu.dot_dimension_numbers<[1], [0], [0], [1], [0, 0, 1, 1], [], []>} : vector<16x256xbf16>, vector<256x128xbf16>, vector<16x128xf32> -> vector<16x128xf32>
    %c2 = arith.constant 2 : index
    %c0_13 = arith.constant 0 : index
    %20 = vector.load %arg4[%c2, %c0_13] : memref<3x256xf32, #tpu.memory_space<vmem>>, vector<1x128xf32>
    %21 = vector.broadcast %20 : vector<1x128xf32> to vector<16x128xf32>
    %22 = arith.addf %19, %21 : vector<16x128xf32>
    %c0_14 = arith.constant 0 : index
    %c0_15 = arith.constant 0 : index
    %23 = vector.load %arg5[%c0_14, %c0_15] : memref<16x128xf32, #tpu.memory_space<vmem>>, vector<16x128xf32>
    tpu.vector_store %arg5[%c0_14, %c0_15], %22 {strides = array<i32>} : memref<16x128xf32, #tpu.memory_space<vmem>>, vector<16x128xf32>,
    return
  }
  func.func @transform_0(%arg0: i32) -> (i32, i32) {
    %c0_i32 = arith.constant 0 : i32
    %c0_i32_0 = arith.constant 0 : i32
    return %arg0, %c0_i32 : i32, i32
  }
  func.func @transform_1(%arg0: i32) -> (i32, i32) {
    %c0_i32 = arith.constant 0 : i32
    %c0_i32_0 = arith.constant 0 : i32
    %c0_i32_1 = arith.constant 0 : i32
    return %c0_i32, %c0_i32_0 : i32, i32
  }
  func.func @transform_2(%arg0: i32) -> (i32, i32) {
    %c0_i32 = arith.constant 0 : i32
    %c0_i32_0 = arith.constant 0 : i32
    %c0_i32_1 = arith.constant 0 : i32
    return %c0_i32, %c0_i32_0 : i32, i32
  }
  func.func @transform_3(%arg0: i32) -> (i32, i32) {
    %c0_i32 = arith.constant 0 : i32
    %c0_i32_0 = arith.constant 0 : i32
    %c0_i32_1 = arith.constant 0 : i32
    return %c0_i32, %c0_i32_0 : i32, i32
  }
  func.func @transform_4(%arg0: i32) -> (i32, i32) {
    %c0_i32 = arith.constant 0 : i32
    %c0_i32_0 = arith.constant 0 : i32
    return %arg0, %c0_i32 : i32, i32
  }
}

</mosaic_0001>

<bundles_post_ra>
// kernel: mlp_forward.1
= control target key start
LH: loop header
LB: loop body
LE: loop exit
PB: predicated region body
PF: predicated region fallthrough
CT: control target
= control target key end

     0   :  { %9 = vsyncpa [#allocation3], 0  ;;  %s831_s0 = inlined_call_operand.vmem [shape: f32[16,32], index: 0, kind: input, shape index: {}]   ;;  %s832_s1 = inlined_call_operand.hbm [shape: bf16[288,256], index: 1, kind: input, shape index: {}]   ;;  %s833_s2 = inlined_call_operand.hbm [shape: bf16[256,128], index: 2, kind: input, shape index: {}]   ;;  %s834_s3 = inlined_call_operand.vmem [shape: f32[3,256], index: 3, kind: input, shape index: {}]   ;;  %s835_s4 = inlined_call_operand.vmem [shape: f32[16,128], index: 4, kind: output, shape index: {}]  }
   0x1   :  { %10 = vsyncpa [#allocation5], 0  ;;  %s772_s15 = smov [#allocation2]  }
   0x2   :  { %s18_s16 = sshll.u32 %s772_s15, 4  ;;  %s19_s16 = int_to_ptr.vmem [resolvable:$true] %s18_s16 }
   0x3   :  { %s736_s17 = scalar_lea.vmem %s19_s16, 4608  ;;  %p741_p1 = scmp.lt.s32.totalorder %s19_s16, %s19_s16 }
   0x4   :  { %p737_p0 = scmp.ne.s32.totalorder %s19_s16, %s736_s17  ;;  %p742_p2 = scmp.lt.s32.totalorder %s736_s17, %s736_s17 }
   0x6   :  { %p743_p3 = por %p742_p2, %p741_p1 }
   0x8   :  { %p744_p4 = pnand %p743_p3, %p737_p0 }
   0xa   :  { %747 = shalt.err (!%p744_p4)
}
   0xb   :  { %s773_s18 = smov 128   ;;  %s774_s19 = smov 8  }
   0xc   :  { %24 = dma.hbm_to_vmem [thread:$0]  %s832_s1, 4608, %s19_s16, [#allocation3], %s773_s18, %s773_s18, %s774_s19  }
   0xd   :  { %s775_s22 = smov [#allocation4]  }
   0xe   :  { %s30_s23 = sshll.u32 %s775_s22, 4  ;;  %s31_s23 = int_to_ptr.vmem [resolvable:$true] %s30_s23 }
   0xf   :  { %s756_s24 = scalar_lea.vmem %s31_s23, 2048  ;;  %p761_p6 = scmp.lt.s32.totalorder %s31_s23, %s31_s23 }
  0x10   :  { %p757_p5 = scmp.ne.s32.totalorder %s31_s23, %s756_s24  ;;  %p762_p7 = scmp.lt.s32.totalorder %s756_s24, %s756_s24 }
  0x12   :  { %p763_p8 = por %p762_p7, %p761_p6 }
  0x14   :  { %p764_p9 = pnand %p763_p8, %p757_p5 }
  0x16   :  { %767 = shalt.err (!%p764_p9)
}
  0x17   :  { %s776_s25 = smov 64   ;;  %s777_s26 = smov 4  }
  0x18   :  { %36 = dma.hbm_to_vmem [thread:$0]  %s833_s2, 2048, %s31_s23, [#allocation5], %s776_s25, %s776_s25, %s777_s26  }
  0x19   :  { %768 = dma.done.wait [#allocation3], 4608  }
  0x1a   :  { %769 = vsyncadd [#allocation3], 4294962688 }
  0x1b   :  { %770 = dma.done.wait [#allocation5], 2048  }
  0x1c   :  { %771 = vsyncadd [#allocation5], 4294965248  ;;  %v778_v0 = vmov 0   ;;  %v658_v1 = vld [vmem:[#allocation2 + $0x14] ss:$8 sps:$4 sm:$0xff]   ;;  %v46_v5 = vld [vmem:[%s831_s0] sm:$0xff]  ;;  %v87_v50 = vlaneseq }
  0x1d   :  { %153 = vmatprep.mubr.bf16.mxu0 %v778_v0  ;;  %v660_v2 = vld [vmem:[#allocation2 + $0x10] ss:$8 sps:$4 sm:$0xff]   ;;  %133 = vmatprep.subr.bf16.mxu0 %v658_v1  ;;  %v661_v3 = vld [vmem:[#allocation2 + $0x4] ss:$8 sps:$4 sm:$0xff]   ;;  %v663_v4 = vld [vmem:[#allocation2] ss:$8 sps:$4 sm:$0xff]  }
  0x1e   :  { %134 = vmatpush1.bf16.msra.mxu0 %v660_v2  ;;  %v47_v6 = vld [vmem:[%s831_s0 + $0x8] sm:$0xff]  ;;  %v664_v7 = vld [vmem:[#allocation2 + $0x94] ss:$8 sps:$4 sm:$0xff]   ;;  %v666_v8 = vld [vmem:[#allocation2 + $0x90] ss:$8 sps:$4 sm:$0xff]   ;;  %vm117_vm0 = vcmask 261120  }
  0x1f   :  { %135 = vmatprep.subr.bf16.mxu0 %v661_v3  ;;  %v667_v9 = vld [vmem:[#allocation2 + $0x84] ss:$8 sps:$4 sm:$0xff]   ;;  %v48_v10 = vpack.c.bf16 %v47_v6, %v46_v5  ;;  %343 = vmatprep.subr.bf16.mxu1 %v664_v7  ;;  %v669_v11 = vld [vmem:[#allocation2 + $0x80] ss:$8 sps:$4 sm:$0xff]   ;;  %v670_v12 = vld [vmem:[#allocation2 + $0x74] ss:$8 sps:$4 sm:$0xff]  }
  0x20   :  { %344 = vmatpush1.bf16.msra.mxu1 %v666_v8  ;;  %v672_v13 = vld [vmem:[#allocation2 + $0x70] ss:$8 sps:$4 sm:$0xff]   ;;  %v673_v14 = vld [vmem:[#allocation2 + $0x64] ss:$8 sps:$4 sm:$0xff]   ;;  %v675_v15 = vld [vmem:[#allocation2 + $0x60] ss:$8 sps:$4 sm:$0xff]  }
  0x21   :  { %345 = vmatprep.subr.bf16.mxu1 %v667_v9  ;;  %v676_v16 = vld [vmem:[#allocation2 + $0x54] ss:$8 sps:$4 sm:$0xff]   ;;  %v678_v17 = vld [vmem:[#allocation2 + $0x50] ss:$8 sps:$4 sm:$0xff]   ;;  %v679_v18 = vld [vmem:[#allocation2 + $0x44] ss:$8 sps:$4 sm:$0xff]  }
  0x22   :  { %136 = vmatpush1.bf16.msra.mxu0 %v663_v4  ;;  %v681_v19 = vld [vmem:[#allocation2 + $0x40] ss:$8 sps:$4 sm:$0xff]   ;;  %v682_v20 = vld [vmem:[#allocation2 + $0x34] ss:$8 sps:$4 sm:$0xff]   ;;  %v684_v21 = vld [vmem:[#allocation2 + $0x30] ss:$8 sps:$4 sm:$0xff]  }
  0x23   :  { %v685_v22 = vld [vmem:[#allocation2 + $0x24] ss:$8 sps:$4 sm:$0xff]   ;;  %v687_v23 = vld [vmem:[#allocation2 + $0x20] ss:$8 sps:$4 sm:$0xff]   ;;  %v688_v24 = vld [vmem:[#allocation2 + $0x114] ss:$8 sps:$4 sm:$0xff]  }
  0x24   :  { %346 = vmatpush1.bf16.msra.mxu1 %v669_v11  ;;  %v690_v25 = vld [vmem:[#allocation2 + $0x110] ss:$8 sps:$4 sm:$0xff]   ;;  %v691_v26 = vld [vmem:[#allocation2 + $0x104] ss:$8 sps:$4 sm:$0xff]   ;;  %v693_v27 = vld [vmem:[#allocation2 + $0x100] ss:$8 sps:$4 sm:$0xff]  }
  0x25   :  { %578 = vmatmul.mubr.msk.bf16.vlgmr.msra.gmra.mxu0 %vm117_vm0, %v48_v10  ;;  %347 = vmatprep.subr.bf16.mxu1 %v670_v12  ;;  %v694_v28 = vld [vmem:[#allocation2 + $0xf4] ss:$8 sps:$4 sm:$0xff]   ;;  %v696_v29 = vld [vmem:[#allocation2 + $0xf0] ss:$8 sps:$4 sm:$0xff]   ;;  %v697_v30 = vld [vmem:[#allocation2 + $0xe4] ss:$8 sps:$4 sm:$0xff]  }
  0x26   :  { %v699_v31 = vld [vmem:[#allocation2 + $0xe0] ss:$8 sps:$4 sm:$0xff]   ;;  %v700_v32 = vld [vmem:[#allocation2 + $0xd4] ss:$8 sps:$4 sm:$0xff]   ;;  %v702_v33 = vld [vmem:[#allocation2 + $0xd0] ss:$8 sps:$4 sm:$0xff]  }
  0x27   :  { %v703_v34 = vld [vmem:[#allocation2 + $0xc4] ss:$8 sps:$4 sm:$0xff]   ;;  %v705_v35 = vld [vmem:[#allocation2 + $0xc0] ss:$8 sps:$4 sm:$0xff]   ;;  %v706_v36 = vld [vmem:[#allocation2 + $0xb4] ss:$8 sps:$4 sm:$0xff]  }
  0x28   :  { %348 = vmatpush1.bf16.msra.mxu1 %v672_v13  ;;  %v708_v37 = vld [vmem:[#allocation2 + $0xb0] ss:$8 sps:$4 sm:$0xff]   ;;  %v709_v38 = vld [vmem:[#allocation2 + $0xa4] ss:$8 sps:$4 sm:$0xff]   ;;  %v711_v39 = vld [vmem:[#allocation2 + $0xa0] ss:$8 sps:$4 sm:$0xff]  }
  0x29   :  { %349 = vmatprep.subr.bf16.mxu1 %v673_v14  ;;  %v712_v40 = vld [vmem:[#allocation4 + $0x78] sm:$0xff]   ;;  %v714_v42 = vld [vmem:[#allocation4 + $0x70] sm:$0xff]   ;;  %v716_v44 = vld [vmem:[#allocation4 + $0x68] sm:$0xff]   ;;  %v88_v51 = vshrl.u32 %v87_v50, 7 }
  0x2a   :  { %v713_v41 = vld [vmem:[#allocation4 + $0x38] sm:$0xff]   ;;  %629 = vmatprep.subr.bf16.mxu0 %v712_v40  ;;  %v715_v43 = vld [vmem:[#allocation4 + $0x30] sm:$0xff]   ;;  %v717_v45 = vld [vmem:[#allocation4 + $0x28] sm:$0xff]  }
  0x2b   :  { %630 = vmatpush3.bf16.msra.mxu0 %v713_v41  ;;  %v718_v46 = vld [vmem:[#allocation4 + $0x60] sm:$0xff]   ;;  %v720_v48 = vld [vmem:[#allocation4 + $0x58] sm:$0xff]   ;;  %v93_v52 = vsub.s32 1, %v88_v51  ;;  %v89_v53 = vsub.s32 0, %v88_v51  ;;  %v722_v7 = vld [vmem:[#allocation4 + $0x50] sm:$0xff]  }
  0x2c   :  { %350 = vmatpush1.bf16.msra.mxu1 %v675_v15  ;;  %631 = vmatprep.subr.bf16.mxu0 %v714_v42  ;;  %v719_v47 = vld [vmem:[#allocation4 + $0x20] sm:$0xff]   ;;  %v721_v49 = vld [vmem:[#allocation4 + $0x18] sm:$0xff]   ;;  %v723_v8 = vld [vmem:[#allocation4 + $0x10] sm:$0xff]  }
  0x2d   :  { %351 = vmatprep.subr.bf16.mxu1 %v676_v16  ;;  %v85_v54 = vld [vmem:[%s834_s3] ss:$4 sm:$0x3]  ;;  %v724_v9 = vld [vmem:[#allocation4 + $0x48] sm:$0xff]  }
  0x2e   :  { %v94_v56 = vrot.slane %v85_v54, %v93_v52  ;;  %v90_v57 = vrot.slane %v85_v54, %v89_v53  ;;  %v725_v10 = vld [vmem:[#allocation4 + $0x8] sm:$0xff]   ;;  %v726_v11 = vld [vmem:[#allocation4 + $0x40] sm:$0xff]  }
  0x2f   :  { %632 = vmatpush3.bf16.msra.mxu0 %v715_v43  ;;  %v727_v12 = vld [vmem:[#allocation4] sm:$0xff]  }
  0x30   :  { %352 = vmatpush1.bf16.msra.mxu1 %v678_v17  ;;  %633 = vmatprep.subr.bf16.mxu0 %v716_v44  ;;  %v579_v13 = vld [vmem:[%s834_s3 + $0x1] ss:$4 sm:$0x3] }
  0x31   :  { %353 = vmatprep.subr.bf16.mxu1 %v679_v18  ;;  %v180_v15 = vrot.slane %v579_v13, %v93_v52  ;;  %v176_v16 = vrot.slane %v579_v13, %v89_v53 }
  0x33   :  { %634 = vmatpush3.bf16.msra.mxu0 %v717_v45 }
  0x34   :  { %354 = vmatpush1.bf16.msra.mxu1 %v681_v19  ;;  %635 = vmatprep.subr.bf16.mxu0 %v718_v46 }
  0x35   :  { %355 = vmatprep.subr.bf16.mxu1 %v682_v20 }
  0x37   :  { %636 = vmatpush3.bf16.msra.mxu0 %v719_v47 }
  0x38   :  { %356 = vmatpush1.bf16.msra.mxu1 %v684_v21  ;;  %637 = vmatprep.subr.bf16.mxu0 %v720_v48 }
  0x39   :  { %357 = vmatprep.subr.bf16.mxu1 %v685_v22 }
  0x3b   :  { %638 = vmatpush3.bf16.msra.mxu0 %v721_v49 }
  0x3c   :  { %358 = vmatpush1.bf16.msra.mxu1 %v687_v23  ;;  %639 = vmatprep.subr.bf16.mxu0 %v722_v7 }
  0x3d   :  { %359 = vmatprep.subr.bf16.mxu1 %v688_v24 }
  0x3f   :  { %640 = vmatpush3.bf16.msra.mxu0 %v723_v8 }
  0x40   :  { %360 = vmatpush2.bf16.msra.mxu1 %v690_v25  ;;  %641 = vmatprep.subr.bf16.mxu0 %v724_v9 }
  0x41   :  { %361 = vmatprep.subr.bf16.mxu1 %v691_v26 }
  0x43   :  { %642 = vmatpush3.bf16.msra.mxu0 %v725_v10 }
  0x44   :  { %362 = vmatpush2.bf16.msra.mxu1 %v693_v27  ;;  %643 = vmatprep.subr.bf16.mxu0 %v726_v11 }
  0x45   :  { %363 = vmatprep.subr.bf16.mxu1 %v694_v28 }
  0x47   :  { %644 = vmatpush3.bf16.msra.mxu0 %v727_v12 }
  0x48   :  { %364 = vmatpush2.bf16.msra.mxu1 %v696_v29 }
  0x49   :  { %365 = vmatprep.subr.bf16.mxu1 %v697_v30 }
  0x4c   :  { %366 = vmatpush2.bf16.msra.mxu1 %v699_v31  ;;  %v612_v31 = vld [vmem:[%s834_s3 + $0x2] ss:$0 sm:$0xff] }
  0x4d   :  { %367 = vmatprep.subr.bf16.mxu1 %v700_v32 }
  0x50   :  { %368 = vmatpush2.bf16.msra.mxu1 %v702_v33 }
  0x51   :  { %369 = vmatprep.subr.bf16.mxu1 %v703_v34 }
  0x54   :  { %370 = vmatpush2.bf16.msra.mxu1 %v705_v35 }
  0x55   :  { %371 = vmatprep.subr.bf16.mxu1 %v706_v36 }
  0x58   :  { %372 = vmatpush2.bf16.msra.mxu1 %v708_v37 }
  0x59   :  { %373 = vmatprep.subr.bf16.mxu1 %v709_v38 }
  0x5c   :  { %374 = vmatpush2.bf16.msra.mxu1 %v711_v39 }
  0xe5   :  { %v155_v55 = vpop.f32.mrf.mxu0 }
  0xe6   :  { %v156_v62 = vadd.f32 %v155_v55, %v90_v57 }
  0xe7   :  { %v157_v58 = vpop.f32.mrf.mxu0 }
  0xe8   :  { %v158_v60 = vadd.f32 %v157_v58, %v94_v56  ;;  %v164_v4 = vmax.f32 %v156_v62, 0.0 }
  0xe9   :  { %v159_v59 = vpop.f32.mrf.mxu0 }
  0xea   :  { %v160_v61 = vadd.f32 %v159_v59, %v90_v57  ;;  %v165_v2 = vmax.f32 %v158_v60, 0.0 }
  0xeb   :  { %v161_v63 = vpop.f32.mrf.mxu0 }
  0xec   :  { %v162_v0 = vadd.f32 %v161_v63, %v94_v56  ;;  %v166_v1 = vmax.f32 %v160_v61, 0.0 }
  0xee   :  { %v167_v3 = vmax.f32 %v162_v0, 0.0  ;;  %v168_v6 = vpack.c.bf16 %v166_v1, %v164_v4 }
  0xf0   :  { %v169_v5 = vpack.c.bf16 %v167_v3, %v165_v2 }
  0xf2   :  { %375 = vmatprep.mubr.bf16.mxu1 %v169_v5 }
  0xf3   :  { %376 = vmatmul.mubr.bf16.vlgmr.msra.gmra.mxu1 %v168_v6 }
 0x1b3   :  { %v377_v14 = vpop.f32.mrf.mxu1 }
 0x1b4   :  { %v378_v21 = vadd.f32 %v377_v14, %v176_v16 }
 0x1b5   :  { %v379_v17 = vpop.f32.mrf.mxu1 }
 0x1b6   :  { %v380_v19 = vadd.f32 %v379_v17, %v180_v15  ;;  %v386_v27 = vmax.f32 %v378_v21, 0.0 }
 0x1b7   :  { %v381_v18 = vpop.f32.mrf.mxu1 }
 0x1b8   :  { %v382_v20 = vadd.f32 %v381_v18, %v176_v16  ;;  %v387_v25 = vmax.f32 %v380_v19, 0.0 }
 0x1b9   :  { %v383_v22 = vpop.f32.mrf.mxu1 }
 0x1ba   :  { %v384_v23 = vadd.f32 %v383_v22, %v180_v15  ;;  %v388_v24 = vmax.f32 %v382_v20, 0.0 }
 0x1bc   :  { %v389_v26 = vmax.f32 %v384_v23, 0.0  ;;  %v390_v29 = vpack.c.bf16 %v388_v24, %v386_v27 }
 0x1be   :  { %v391_v28 = vpack.c.bf16 %v389_v26, %v387_v25 }
 0x1c0   :  { %557 = vmatprep.mubr.bf16.mxu0 %v391_v28 }
 0x1c1   :  { %558 = vmatmul.mubr.bf16.vlgmr.msra.gmra.mxu0 %v390_v29 }
 0x281   :  { %v645_v30 = vpop.f32.mrf.mxu0 }
 0x283   :  { %v646_v32 = vpop.f32.mrf.mxu0 }
 0x284   :  { %v647_v33 = vadd.f32 %v646_v32, %v645_v30 }
 0x285   :  { %v648_v34 = vpop.f32.mrf.mxu0 }
 0x286   :  { %v560_v35 = vadd.f32 %v647_v33, %v612_v31 }
 0x287   :  { %v649_v36 = vpop.f32.mrf.mxu0 }
 0x288   :  { %566 = vst [vmem:[%s835_s4] sm:$0xff] %v560_v35  ;;  %v650_v37 = vadd.f32 %v649_v36, %v648_v34 }
 0x28a   :  { %v563_v38 = vadd.f32 %v650_v37, %v612_v31 }
 0x28c   :  { %567 = vst [vmem:[%s835_s4 + $0x8] sm:$0xff] %v563_v38 }
 0x28d   :  { %572 = vsyncpa [#allocation3], 1 }
 0x28e   :  { %573 = vsyncpa [#allocation5], 1 }

</bundles_post_ra>
